<compile_context>
chip_gen: v7x
topology: tpu7x:2x2x1
jax: 0.10.0
libtpu: 0.0.40
codegen_flags: <defaults>
</compile_context>

<pallas_src>
import functools

import jax
import jax.numpy as jnp
import numpy as np
from jax import lax
from jax.experimental import pallas as pl
from jax.experimental.pallas import tpu as pltpu


def _round_up(x, m):
    return ((x + m - 1) // m) * m


# ---------------- configuration (small, consistent with the module) ----------------
BATCH = 2
OBS_L = 16          # multi_branch_obs_dim[0][0]
OBS_W = 4           # multi_branch_obs_dim[0][1]
C1, C2 = 16, 32     # conv channel counts (network_cnn_mlp)
HIDDEN = (32, 32)   # hidden_sizes
L1 = OBS_L - 2      # length after conv1
L2 = OBS_L - 4      # length after conv2
P_OUT = L2 // 2     # pooled length
FEAT = C2 * P_OUT   # flattened CNN feature size (sizes[0]) = 192

D_IN = OBS_L * OBS_W            # 64  : flat obs width
D_H1 = L1 * C1                  # 224 : conv1 activation width (layout l*C1 + c1)
D_H1P = _round_up(D_H1, 128)    # 256 : padded (lane-dense) conv1 width / conv2 K
D_H2 = 2 * FEAT                 # 384 : conv2 activation width (pool-friendly layout)

# ------------------------- packed bf16 weight slab layout (rows, 384) ----------------
SLAB_COLS = D_H2                      # 384 (multiple of 128)
R_W1 = 0                              # (D_IN , D_H1P)  banded conv1 (zero-padded cols)
R_W2 = R_W1 + D_IN                    # (D_H1P, D_H2)   banded conv2 (permuted cols, zero rows)
R_WM1 = R_W2 + D_H1P                  # (FEAT, H0)
R_WM2 = R_WM1 + FEAT                  # (H0, H1)
R_WM3 = R_WM2 + HIDDEN[0]             # (H1, 1)
SLAB_ROWS = _round_up(R_WM3 + HIDDEN[1], 16)   # 576 (bf16 sublane-pack aligned)
N_BIAS_ROWS = 8                       # separate small f32 bias array (5 rows used)

# pool-as-two-contiguous-halves trick requires an even conv2 length
assert L2 % 2 == 0 and D_H2 == 2 * FEAT, "conv2 output length must be even"
assert D_H1P % 128 == 0 and D_H2 % 128 == 0 and SLAB_COLS % 128 == 0
assert all(r % 16 == 0 for r in (R_W1, R_W2, R_WM1, R_WM2, R_WM3, SLAB_ROWS))


# --------------------------------- Pallas kernel -----------------------------------
def _critic_kernel(obs_ref, w_ref, b_ref, out_ref, *, tb):
    bf16 = jnp.bfloat16
    x = obs_ref[...].astype(bf16)                                      # (tb, 64)

    # conv1 + tanh : single banded bf16 MXU matmul (f32 acc), output layout (l, c1)
    h = jnp.dot(x, w_ref[R_W1:R_W1 + D_IN, :D_H1P],
                preferred_element_type=jnp.float32)                    # (tb, 256) f32
    h = jnp.tanh((h + b_ref[0:1, :D_H1P]).astype(bf16))                # bf16 EUP on v6e/v7x

    # conv2 : banded bf16 matmul; columns pre-permuted so the two max-pool operands are
    # the contiguous halves, already in torch (c2, p) flatten order.
    h = jnp.dot(h, w_ref[R_W2:R_W2 + D_H1P, :D_H2],
                preferred_element_type=jnp.float32)                    # (tb, 384) f32
    h = h + b_ref[1:2, :D_H2]
    # max_pool2d((2,1),2) BEFORE tanh (tanh monotonic -> identical result, half the tanhs)
    h = jnp.maximum(h[:, :FEAT], h[:, FEAT:])                          # (tb, 192) f32
    h = jnp.tanh(h.astype(bf16))                                       # (tb, 192) bf16

    # MLP head: Tanh, Tanh, Identity (tiny head tanhs kept in f32)
    h = jnp.tanh(jnp.dot(h, w_ref[R_WM1:R_WM1 + FEAT, :HIDDEN[0]],
                         preferred_element_type=jnp.float32)
                 + b_ref[2:3, :HIDDEN[0]]).astype(bf16)
    h = jnp.tanh(jnp.dot(h, w_ref[R_WM2:R_WM2 + HIDDEN[0], :HIDDEN[1]],
                         preferred_element_type=jnp.float32)
                 + b_ref[3:4, :HIDDEN[1]]).astype(bf16)
    v = jnp.dot(h, w_ref[R_WM3:R_WM3 + HIDDEN[1], :1],
                preferred_element_type=jnp.float32) + b_ref[4:5, :1]   # (tb, 1) f32

    out_ref[...] = v.reshape(1, tb)                                    # lane-dense output


# ------------------- one-time (init-time) weight preprocessing ----------------------
def pack_params(params):
    """Lower both convs to banded matmuls and pack all weights into one bf16 slab plus a
    small f32 bias array.  Call ONCE at init and reuse — hoisted out of the forward."""
    (w1c, b1, w2c, b2, wm1, bm1, wm2, bm2, wm3, bm3) = params
    f32 = jnp.float32

    # --- conv1 -> banded matmul weight: band1[(l+kh)*W + kw, l*C1 + c] = w1[c,0,kh,kw]
    w1f = w1c.astype(f32).reshape(C1, 3 * OBS_W).T                     # (3W, C1), row = kh*W+kw
    sel1 = np.zeros((D_IN, 3 * OBS_W, L1), np.float32)
    for l in range(L1):
        for r in range(3 * OBS_W):
            sel1[l * OBS_W + r, r, l] = 1.0
    w1_band = jnp.einsum('irl,rc->ilc', jnp.asarray(sel1), w1f).reshape(D_IN, D_H1)
    b1_t = jnp.tile(b1.astype(f32), L1)                                # idx l*C1 + c -> b1[c]

    # --- conv2 -> banded matmul weight in (l, c2) column order first:
    #     band2[(l+kh)*C1 + c1, l*C2 + c2] = w2[c2, c1, kh, 0]
    w2m = w2c[:, :, :, 0].astype(f32)                                  # (C2, C1, 3)
    sel2 = np.zeros((L1, L2, 3), np.float32)
    for l in range(L2):
        for kh in range(3):
            sel2[l + kh, l, kh] = 1.0
    w2_band = jnp.einsum('alk,cbk->ablc', jnp.asarray(sel2), w2m).reshape(D_H1, L2 * C2)

    # permute output columns: new col (c2, l) = (l % 2) * FEAT + c2 * P_OUT + l // 2
    # -> the two max-pool operands are contiguous halves, each in torch (c2, p) order.
    perm = np.empty((D_H2,), np.int32)
    for l in range(L2):
        for c in range(C2):
            perm[(l % 2) * FEAT + c * P_OUT + l // 2] = l * C2 + c
    w2_band = w2_band[:, perm]
    b2_t = jnp.tile(b2.astype(f32), L2)[perm]

    # --- pack weights into one (SLAB_ROWS, 384) slab; store as bf16 (halved DMA/VMEM)
    slab = jnp.zeros((SLAB_ROWS, SLAB_COLS), f32)
    slab = slab.at[R_W1:R_W1 + D_IN, :D_H1].set(w1_band)               # cols 224:256 stay 0
    slab = slab.at[R_W2:R_W2 + D_H1, :D_H2].set(w2_band)               # rows 224:256 stay 0
    slab = slab.at[R_WM1:R_WM1 + FEAT, :HIDDEN[0]].set(wm1.astype(f32))
    slab = slab.at[R_WM2:R_WM2 + HIDDEN[0], :HIDDEN[1]].set(wm2.astype(f32))
    slab = slab.at[R_WM3:R_WM3 + HIDDEN[1], :1].set(wm3.astype(f32))

    biases = jnp.zeros((N_BIAS_ROWS, SLAB_COLS), f32)                  # biases kept f32 (exact)
    biases = biases.at[0, :D_H1].set(b1_t)
    biases = biases.at[1, :D_H2].set(b2_t)
    biases = biases.at[2, :HIDDEN[0]].set(bm1.astype(f32))
    biases = biases.at[3, :HIDDEN[1]].set(bm2.astype(f32))
    biases = biases.at[4, :1].set(bm3.astype(f32))
    return slab.astype(jnp.bfloat16), biases


# ------------------------------------ forward ---------------------------------------
@jax.jit
def cnn_critic_forward(obs, w_slab, biases):
    """CNNCritic value forward.  w_slab/biases come from pack_params() (called once)."""
    B = obs.shape[0]
    b8 = _round_up(B, 8)
    if b8 < 256:
        tb = b8                                  # single full-batch tile (block == array)
    else:
        # tile is a multiple of 128 (lane-dense output blocks), capped at 512, and small
        # enough to give >= 2 grid steps so both v7x TensorCores get work.
        tb = max(128, min(512, (b8 // 2) // 128 * 128))
    b_pad = _round_up(B, tb)
    obs_p = jnp.pad(obs.astype(jnp.float32), ((0, b_pad - B), (0, 0)))

    cost = pl.CostEstimate(
        flops=2 * b_pad * (D_IN * D_H1P + D_H1P * D_H2
                           + FEAT * HIDDEN[0] + HIDDEN[0] * HIDDEN[1] + HIDDEN[1]),
        transcendentals=b_pad * (D_H1P + FEAT + HIDDEN[0] + HIDDEN[1]),
        bytes_accessed=(obs_p.size * 4 + SLAB_ROWS * SLAB_COLS * 2
                        + N_BIAS_ROWS * SLAB_COLS * 4 + b_pad * 4),
    )

    kernel = functools.partial(_critic_kernel, tb=tb)
    out = pl.pallas_call(
        kernel,
        out_shape=jax.ShapeDtypeStruct((1, b_pad), jnp.float32),
        grid=(b_pad // tb,),
        in_specs=[
            pl.BlockSpec((tb, D_IN), lambda i: (i, 0)),                 # obs: pipelined tiles
            pl.BlockSpec((SLAB_ROWS, SLAB_COLS), lambda i: (0, 0)),     # bf16 weights: resident
            pl.BlockSpec((N_BIAS_ROWS, SLAB_COLS), lambda i: (0, 0)),   # f32 biases: resident
        ],
        out_specs=pl.BlockSpec((1, tb), lambda i: (0, i)),              # lane-dense output
        compiler_params=pltpu.CompilerParams(
            dimension_semantics=("parallel",),                          # v7x: 2 TCs share tiles
            vmem_limit_bytes=32 * 1024 * 1024),
        cost_estimate=cost,
    )(obs_p, w_slab, biases)
    return out[0, :B]                              # torch.squeeze(x, -1)


# ------------------------- plain-JAX reference (torch semantics) --------------------
def reference_forward(obs, params):
    (w1c, b1, w2c, b2, wm1, bm1, wm2, bm2, wm3, bm3) = params
    B = obs.shape[0]
    x = obs.reshape(B, 1, OBS_L, OBS_W)                               # NCHW
    dn = ('NCHW', 'OIHW', 'NCHW')
    y = lax.conv_general_dilated(x, w1c, (1, 1), 'VALID', dimension_numbers=dn)
    y = jnp.tanh(y + b1[None, :, None, None])
    y = lax.conv_general_dilated(y, w2c, (1, 1), 'VALID', dimension_numbers=dn)
    y = jnp.tanh(y + b2[None, :, None, None])                         # (B, 32, L-4, 1)
    y = y[:, :, :2 * P_OUT, 0].reshape(B, C2, P_OUT, 2).max(-1)       # max_pool2d (2,1)/2
    f = y.reshape(B, C2 * P_OUT)                                      # torch flatten (c, p)
    h = jnp.tanh(f @ wm1 + bm1)
    h = jnp.tanh(h @ wm2 + bm2)
    v = h @ wm3 + bm3
    return jnp.squeeze(v, -1)


# ------------------------------------- main ------------------------------------------
if __name__ == "__main__":
    key = jax.random.PRNGKey(0)
    ks = jax.random.split(key, 12)
    s = 0.1
    params = (
        s * jax.random.normal(ks[0], (C1, 1, 3, OBS_W), jnp.float32),   # conv1 weight (OIHW)
        s * jax.random.normal(ks[1], (C1,), jnp.float32),               # conv1 bias
        s * jax.random.normal(ks[2], (C2, C1, 3, 1), jnp.float32),      # conv2 weight (OIHW)
        s * jax.random.normal(ks[3], (C2,), jnp.float32),               # conv2 bias
        s * jax.random.normal(ks[4], (FEAT, HIDDEN[0]), jnp.float32),   # mlp W1 (in, out)
        s * jax.random.normal(ks[5], (HIDDEN[0],), jnp.float32),
        s * jax.random.normal(ks[6], (HIDDEN[0], HIDDEN[1]), jnp.float32),
        s * jax.random.normal(ks[7], (HIDDEN[1],), jnp.float32),
        s * jax.random.normal(ks[8], (HIDDEN[1], 1), jnp.float32),
        s * jax.random.normal(ks[9], (1,), jnp.float32),
    )
    obs = jax.random.normal(ks[11], (BATCH, OBS_L * OBS_W), jnp.float32)

    # Weight packing done ONCE at init (hoisted out of the per-call forward path).
    w_slab, biases = pack_params(params)

    out = jax.block_until_ready(cnn_critic_forward(obs, w_slab, biases))
    ref = jax.block_until_ready(reference_forward(obs, params))

    assert out.shape == (BATCH,), out.shape
    # bf16 MXU operands / bf16 conv tanhs -> looser tolerance than the pure-f32 kernel.
    np.testing.assert_allclose(np.asarray(out), np.asarray(ref), rtol=2e-2, atol=2e-2)
    print("KERNEL_OK")
</pallas_src>

<mosaic_0001>
module attributes {stable_mosaic.version = 11 : i64} {
  func.func @_critic_kernel(%arg0: i32, %arg1: memref<8x64xf32, #tpu.memory_space<vmem>>, %arg2: memref<576x384xbf16, #tpu.memory_space<vmem>>, %arg3: memref<8x384xf32, #tpu.memory_space<vmem>>, %arg4: memref<1x8xf32, #tpu.memory_space<vmem>>) attributes {dimension_semantics = [#tpu.dimension_semantics<parallel>], iteration_bounds = array<i64: 1>, scalar_prefetch = 0 : i64, scratch_operands = 0 : i64, tpu.core_type = #tpu.core_type<tc>, window_params = [{transform_indices = @transform_0, window_bounds = array<i64: 8, 64>}, {pipeline_mode = #tpu.pipeline_mode<synchronous>, transform_indices = @transform_1, window_bounds = array<i64: 576, 384>}, {pipeline_mode = #tpu.pipeline_mode<synchronous>, transform_indices = @transform_2, window_bounds = array<i64: 8, 384>}, {transform_indices = @transform_3, window_bounds = array<i64: 1, 8>}]} {
    %c0 = arith.constant 0 : index
    %c0_0 = arith.constant 0 : index
    %0 = vector.load %arg1[%c0, %c0_0] : memref<8x64xf32, #tpu.memory_space<vmem>>, vector<8x64xf32>
    %1 = arith.truncf %0 : vector<8x64xf32> to vector<8x64xbf16>
    %c0_1 = arith.constant 0 : index
    %c0_2 = arith.constant 0 : index
    %2 = vector.load %arg2[%c0_1, %c0_2] : memref<576x384xbf16, #tpu.memory_space<vmem>>, vector<64x256xbf16>
    %cst = arith.constant dense<0.000000e+00> : vector<8x256xf32>
    %3 = tpu.matmul %1, %2, %cst {dimension_numbers = #tpu.dot_dimension_numbers<[1], [0], [0], [1], [0, 0, 1, 1], [], []>} : vector<8x64xbf16>, vector<64x256xbf16>, vector<8x256xf32> -> vector<8x256xf32>
    %c0_3 = arith.constant 0 : index
    %c0_4 = arith.constant 0 : index
    %4 = vector.load %arg3[%c0_3, %c0_4] : memref<8x384xf32, #tpu.memory_space<vmem>>, vector<1x256xf32>
    %5 = vector.broadcast %4 : vector<1x256xf32> to vector<8x256xf32>
    %6 = arith.addf %3, %5 : vector<8x256xf32>
    %7 = arith.truncf %6 : vector<8x256xf32> to vector<8x256xbf16>
    %8 = math.tanh %7 : vector<8x256xbf16>
    %c64 = arith.constant 64 : index
    %c0_5 = arith.constant 0 : index
    %9 = vector.load %arg2[%c64, %c0_5] : memref<576x384xbf16, #tpu.memory_space<vmem>>, vector<256x384xbf16>
    %cst_6 = arith.constant dense<0.000000e+00> : vector<8x384xf32>
    %10 = tpu.matmul %8, %9, %cst_6 {dimension_numbers = #tpu.dot_dimension_numbers<[1], [0], [0], [1], [0, 0, 1, 1], [], []>} : vector<8x256xbf16>, vector<256x384xbf16>, vector<8x384xf32> -> vector<8x384xf32>
    %c1 = arith.constant 1 : index
    %c0_7 = arith.constant 0 : index
    %11 = vector.load %arg3[%c1, %c0_7] : memref<8x384xf32, #tpu.memory_space<vmem>>, vector<1x384xf32>
    %12 = vector.broadcast %11 : vector<1x384xf32> to vector<8x384xf32>
    %13 = arith.addf %10, %12 : vector<8x384xf32>
    %14 = vector.extract_strided_slice %13 {offsets = [0, 0], sizes = [8, 192], strides = [1, 1]} : vector<8x384xf32> to vector<8x192xf32>
    %15 = vector.extract_strided_slice %13 {offsets = [0, 192], sizes = [8, 192], strides = [1, 1]} : vector<8x384xf32> to vector<8x192xf32>
    %16 = arith.maximumf %14, %15 : vector<8x192xf32>
    %17 = arith.truncf %16 : vector<8x192xf32> to vector<8x192xbf16>
    %18 = math.tanh %17 : vector<8x192xbf16>
    %c320 = arith.constant 320 : index
    %c0_8 = arith.constant 0 : index
    %19 = vector.load %arg2[%c320, %c0_8] : memref<576x384xbf16, #tpu.memory_space<vmem>>, vector<192x32xbf16>
    %cst_9 = arith.constant dense<0.000000e+00> : vector<8x32xf32>
    %20 = tpu.matmul %18, %19, %cst_9 {dimension_numbers = #tpu.dot_dimension_numbers<[1], [0], [0], [1], [0, 0, 1, 1], [], []>} : vector<8x192xbf16>, vector<192x32xbf16>, vector<8x32xf32> -> vector<8x32xf32>
    %c2 = arith.constant 2 : index
    %c0_10 = arith.constant 0 : index
    %21 = vector.load %arg3[%c2, %c0_10] : memref<8x384xf32, #tpu.memory_space<vmem>>, vector<1x32xf32>
    %22 = vector.broadcast %21 : vector<1x32xf32> to vector<8x32xf32>
    %23 = arith.addf %20, %22 : vector<8x32xf32>
    %24 = math.tanh %23 : vector<8x32xf32>
    %25 = arith.truncf %24 : vector<8x32xf32> to vector<8x32xbf16>
    %c512 = arith.constant 512 : index
    %c0_11 = arith.constant 0 : index
    %26 = vector.load %arg2[%c512, %c0_11] : memref<576x384xbf16, #tpu.memory_space<vmem>>, vector<32x32xbf16>
    %cst_12 = arith.constant dense<0.000000e+00> : vector<8x32xf32>
    %27 = tpu.matmul %25, %26, %cst_12 {dimension_numbers = #tpu.dot_dimension_numbers<[1], [0], [0], [1], [0, 0, 1, 1], [], []>} : vector<8x32xbf16>, vector<32x32xbf16>, vector<8x32xf32> -> vector<8x32xf32>
    %c3 = arith.constant 3 : index
    %c0_13 = arith.constant 0 : index
    %28 = vector.load %arg3[%c3, %c0_13] : memref<8x384xf32, #tpu.memory_space<vmem>>, vector<1x32xf32>
    %29 = vector.broadcast %28 : vector<1x32xf32> to vector<8x32xf32>
    %30 = arith.addf %27, %29 : vector<8x32xf32>
    %31 = math.tanh %30 : vector<8x32xf32>
    %32 = arith.truncf %31 : vector<8x32xf32> to vector<8x32xbf16>
    %c544 = arith.constant 544 : index
    %c0_14 = arith.constant 0 : index
    %33 = vector.load %arg2[%c544, %c0_14] : memref<576x384xbf16, #tpu.memory_space<vmem>>, vector<32x1xbf16>
    %cst_15 = arith.constant dense<0.000000e+00> : vector<8x1xf32>
    %34 = tpu.matmul %32, %33, %cst_15 {dimension_numbers = #tpu.dot_dimension_numbers<[1], [0], [0], [1], [0, 0, 1, 1], [], []>} : vector<8x32xbf16>, vector<32x1xbf16>, vector<8x1xf32> -> vector<8x1xf32>
    %c4 = arith.constant 4 : index
    %c0_16 = arith.constant 0 : index
    %35 = vector.load %arg3[%c4, %c0_16] : memref<8x384xf32, #tpu.memory_space<vmem>>, vector<1x1xf32>
    %36 = vector.broadcast %35 : vector<1x1xf32> to vector<8x1xf32>
    %37 = arith.addf %34, %36 : vector<8x1xf32>
    %38 = vector.shape_cast %37 : vector<8x1xf32> to vector<1x8xf32>
    %c0_17 = arith.constant 0 : index
    %c0_18 = arith.constant 0 : index
    %39 = vector.load %arg4[%c0_17, %c0_18] : memref<1x8xf32, #tpu.memory_space<vmem>>, vector<1x8xf32>
    tpu.vector_store %arg4[%c0_17, %c0_18], %38 {strides = array<i32>} : memref<1x8xf32, #tpu.memory_space<vmem>>, vector<1x8xf32>,
    return
  }
  func.func @transform_0(%arg0: i32) -> (i32, i32) {
    %c0_i32 = arith.constant 0 : i32
    %c0_i32_0 = arith.constant 0 : i32
    return %arg0, %c0_i32 : i32, i32
  }
  func.func @transform_1(%arg0: i32) -> (i32, i32) {
    %c0_i32 = arith.constant 0 : i32
    %c0_i32_0 = arith.constant 0 : i32
    %c0_i32_1 = arith.constant 0 : i32
    return %c0_i32, %c0_i32_0 : i32, i32
  }
  func.func @transform_2(%arg0: i32) -> (i32, i32) {
    %c0_i32 = arith.constant 0 : i32
    %c0_i32_0 = arith.constant 0 : i32
    %c0_i32_1 = arith.constant 0 : i32
    return %c0_i32, %c0_i32_0 : i32, i32
  }
  func.func @transform_3(%arg0: i32) -> (i32, i32) {
    %c0_i32 = arith.constant 0 : i32
    %c0_i32_0 = arith.constant 0 : i32
    return %c0_i32, %arg0 : i32, i32
  }
}

</mosaic_0001>

<bundles_post_ra>
// kernel: cnn_critic_forward.1
= control target key start
LH: loop header
LB: loop body
LE: loop exit
PB: predicated region body
PF: predicated region fallthrough
CT: control target
= control target key end

     0   :  { %8 = vsyncpa [#allocation3], 0  ;;  %s1245_s0 = inlined_call_operand.vmem [shape: f32[8,64], index: 0, kind: input, shape index: {}]   ;;  %s1246_s1 = inlined_call_operand.hbm [shape: bf16[576,384], index: 1, kind: input, shape index: {}]   ;;  %s1247_s2 = inlined_call_operand.hbm [shape: f32[8,384], index: 2, kind: input, shape index: {}]   ;;  %s1248_s3 = inlined_call_operand.vmem [shape: f32[1,8], index: 3, kind: output, shape index: {}]  }
   0x1   :  { %9 = vsyncpa [#allocation5], 0  ;;  %s1156_s12 = smov [#allocation2]   ;;  %s1108_s16 = scalar_lea.hbm %s1246_s1, 13824 }
   0x2   :  { %s17_s13 = sshll.u32 %s1156_s12, 4  ;;  %p1109_p0 = scmp.ne.s32.totalorder %s1246_s1, %s1108_s16  ;;  %s18_s13 = int_to_ptr.vmem [resolvable:$true] %s17_s13 }
   0x3   :  { %p1112_p1 = scmp.lt.u32.totalorder %s1108_s16, %s1246_s1 }
   0x5   :  { %p1114_p2 = pnand %p1112_p1, %p1109_p0 }
   0x7   :  { %1117 = shalt.err (!%p1114_p2)
}
   0x8   :  { %s1118_s21 = scalar_lea.vmem %s18_s13, 13824  ;;  %p1123_p4 = scmp.lt.s32.totalorder %s18_s13, %s18_s13 }
   0x9   :  { %p1119_p3 = scmp.ne.s32.totalorder %s18_s13, %s1118_s21  ;;  %p1124_p5 = scmp.lt.s32.totalorder %s1118_s21, %s1118_s21 }
   0xb   :  { %p1125_p6 = por %p1124_p5, %p1123_p4 }
   0xd   :  { %p1126_p7 = pnand %p1125_p6, %p1119_p3 }
   0xf   :  { %1129 = shalt.err (!%p1126_p7)
}
  0x10   :  { %s1157_s22 = smov 192   ;;  %s1158_s23 = smov 12  }
  0x11   :  { %23 = dma.hbm_to_vmem [thread:$0]  %s1246_s1, 13824, %s18_s13, [#allocation3], %s1157_s22, %s1157_s22, %s1158_s23  }
  0x12   :  { %s1159_s26 = smov [#allocation4]   ;;  %s1130_s30 = scalar_lea.hbm %s1247_s2, 384 }
  0x13   :  { %s30_s27 = sshll.u32 %s1159_s26, 4  ;;  %p1131_p8 = scmp.ne.s32.totalorder %s1247_s2, %s1130_s30  ;;  %s31_s27 = int_to_ptr.vmem [resolvable:$true] %s30_s27 }
  0x14   :  { %p1134_p9 = scmp.lt.u32.totalorder %s1130_s30, %s1247_s2 }
  0x16   :  { %p1136_p10 = pnand %p1134_p9, %p1131_p8 }
  0x18   :  { %1139 = shalt.err (!%p1136_p10)
}
  0x19   :  { %s1140_s8 = scalar_lea.vmem %s31_s27, 384  ;;  %p1145_p12 = scmp.lt.s32.totalorder %s31_s27, %s31_s27 }
  0x1a   :  { %p1141_p11 = scmp.ne.s32.totalorder %s31_s27, %s1140_s8  ;;  %p1146_p13 = scmp.lt.s32.totalorder %s1140_s8, %s1140_s8 }
  0x1c   :  { %p1147_p0 = por %p1146_p13, %p1145_p12 }
  0x1e   :  { %p1148_p1 = pnand %p1147_p0, %p1141_p11 }
  0x20   :  { %1151 = shalt.err (!%p1148_p1)
}
  0x21   :  { %33 = dma.hbm_to_vmem [thread:$0]  %s1247_s2, 384, %s31_s27, [#allocation5]  }
  0x22   :  { %1152 = dma.done.wait [#allocation3], 13824  }
  0x23   :  { %1153 = vsyncadd [#allocation3], 4294953472 }
  0x24   :  { %1154 = dma.done.wait [#allocation5], 384  }
  0x25   :  { %1155 = vsyncadd [#allocation5], 4294966912  ;;  %v1160_v0 = vmov 0   ;;  %v1004_v1 = vld [vmem:[#allocation2 + $0x4] ss:$12 sps:$4 sm:$0xff]   ;;  %vm103_vm0 = vcmask 523264   ;;  %v53_v59 = vlaneseq }
  0x26   :  { %139 = vmatprep.mubr.bf16.mxu0 %v1160_v0  ;;  %1003 = vset.pattern.permute.xlu0 %v1160_v0  ;;  %v1006_v2 = vld [vmem:[#allocation2] ss:$12 sps:$4 sm:$0xff]   ;;  %v1007_v3 = vld [vmem:[#allocation2 + $0x1c] ss:$12 sps:$4 sm:$0xff]   ;;  %v1009_v4 = vld [vmem:[#allocation2 + $0x18] ss:$12 sps:$4 sm:$0xff]  }
  0x27   :  { %107 = vmatprep.subr.bf16.mxu0 %v1004_v1  ;;  %v1010_v5 = vld [vmem:[#allocation2 + $0x34] ss:$12 sps:$4 sm:$0xff]   ;;  %v1012_v6 = vld [vmem:[#allocation2 + $0x30] ss:$12 sps:$4 sm:$0xff]   ;;  %v1013_v10 = vld [vmem:[#allocation2 + $0x4c] ss:$12 sps:$4 sm:$0xff]  }
  0x28   :  { %108 = vmatpush1.bf16.msra.mxu0 %v1006_v2  ;;  %v1016_v7 = vld [vmem:[#allocation2 + $0x64] ss:$12 sps:$4 sm:$0xff]   ;;  %v1018_v8 = vld [vmem:[#allocation2 + $0x60] ss:$12 sps:$4 sm:$0xff]   ;;  %v1019_v9 = vld [vmem:[#allocation2 + $0x7c] ss:$12 sps:$4 sm:$0xff]  }
  0x29   :  { %109 = vmatprep.subr.bf16.mxu0 %v1007_v3  ;;  %490 = vmatprep.subr.bf16.mxu1 %v1016_v7  ;;  %v1021_v11 = vld [vmem:[#allocation2 + $0x78] ss:$12 sps:$4 sm:$0xff]   ;;  %v1015_v12 = vld [vmem:[#allocation2 + $0x48] ss:$12 sps:$4 sm:$0xff]   ;;  %v1024_v15 = vld [vmem:[#allocation2 + $0x90] ss:$12 sps:$4 sm:$0xff]  }
  0x2a   :  { %491 = vmatpush1.bf16.msra.mxu1 %v1018_v8  ;;  %v1022_v13 = vld [vmem:[#allocation2 + $0x94] ss:$12 sps:$4 sm:$0xff]   ;;  %v1025_v17 = vld [vmem:[#allocation2 + $0xac] ss:$12 sps:$4 sm:$0xff]   ;;  %v1028_v19 = vld [vmem:[#allocation2 + $0xc4] ss:$12 sps:$4 sm:$0xff]  }
  0x2b   :  { %492 = vmatprep.subr.bf16.mxu1 %v1019_v9  ;;  %v41_v14 = vld [vmem:[%s1245_s0] sm:$0xff]  ;;  %v1027_v18 = vld [vmem:[#allocation2 + $0xa8] ss:$12 sps:$4 sm:$0xff]   ;;  %v1036_v30 = vld [vmem:[#allocation2 + $0xf0] ss:$12 sps:$4 sm:$0xff]   ;;  %v1216_v60 = vshrl.u32 %v53_v59, 7 }
  0x2c   :  { %110 = vmatpush1.bf16.msra.mxu0 %v1009_v4  ;;  %v42_v16 = vpack.c.bf16 %v41_v14, %v41_v14  ;;  %v1042_v20 = vld [vmem:[#allocation2 + $0x128] ss:$12 sps:$4 sm:$0xff]   ;;  %v1030_v22 = vld [vmem:[#allocation2 + $0xc0] ss:$12 sps:$4 sm:$0xff]   ;;  %v1033_v26 = vld [vmem:[#allocation2 + $0xd8] ss:$12 sps:$4 sm:$0xff]  }
  0x2d   :  { %111 = vmatprep.subr.bf16.mxu0 %v1010_v5  ;;  %v1044_v21 = vld [vmem:[#allocation2 + $0x68] ss:$12 sps:$4 sm:$0xff]   ;;  %v1047_v24 = vld [vmem:[#allocation2 + $0x140] ss:$12 sps:$4 sm:$0xff]   ;;  %v1052_v27 = vld [vmem:[#allocation2 + $0x158] ss:$12 sps:$4 sm:$0xff]  }
  0x2e   :  { %493 = vmatpush1.bf16.msra.mxu1 %v1021_v11  ;;  %v1031_v23 = vld [vmem:[#allocation2 + $0xdc] ss:$12 sps:$4 sm:$0xff]   ;;  %v1049_v25 = vld [vmem:[#allocation2 + $0x80] ss:$12 sps:$4 sm:$0xff]   ;;  %v1054_v29 = vld [vmem:[#allocation2 + $0x98] ss:$12 sps:$4 sm:$0xff]  }
  0x2f   :  { %494 = vmatprep.subr.bf16.mxu1 %v1022_v13  ;;  %v1034_v28 = vld [vmem:[#allocation2 + $0xf4] ss:$12 sps:$4 sm:$0xff]   ;;  %v1037_v31 = vld [vmem:[#allocation2 + $0x10c] ss:$12 sps:$4 sm:$0xff]   ;;  %v1057_v32 = vld [vmem:[#allocation2 + $0x170] ss:$12 sps:$4 sm:$0xff]  }
  0x30   :  { %112 = vmatpush1.bf16.msra.mxu0 %v1012_v6  ;;  %v1039_v33 = vld [vmem:[#allocation2 + $0x108] ss:$12 sps:$4 sm:$0xff]   ;;  %v1040_v34 = vld [vmem:[#allocation2 + $0x124] ss:$12 sps:$4 sm:$0xff]   ;;  %v1043_v35 = vld [vmem:[#allocation2 + $0x120] ss:$12 sps:$4 sm:$0xff]  }
  0x31   :  { %113 = vmatprep.subr.bf16.mxu0 %v1013_v10  ;;  %v1045_v36 = vld [vmem:[#allocation2 + $0x13c] ss:$12 sps:$4 sm:$0xff]   ;;  %v1048_v37 = vld [vmem:[#allocation2 + $0x138] ss:$12 sps:$4 sm:$0xff]   ;;  %v1050_v38 = vld [vmem:[#allocation2 + $0x154] ss:$12 sps:$4 sm:$0xff]  }
  0x32   :  { %495 = vmatpush1.bf16.msra.mxu1 %v1024_v15  ;;  %v1053_v39 = vld [vmem:[#allocation2 + $0x150] ss:$12 sps:$4 sm:$0xff]   ;;  %v1055_v40 = vld [vmem:[#allocation2 + $0x16c] ss:$12 sps:$4 sm:$0xff]   ;;  %v1058_v41 = vld [vmem:[#allocation2 + $0x168] ss:$12 sps:$4 sm:$0xff]  }
  0x33   :  { %496 = vmatprep.subr.bf16.mxu1 %v1025_v17  ;;  %v1059_v42 = vld [vmem:[#allocation2 + $0xb0] ss:$12 sps:$4 sm:$0xff]   ;;  %v1062_v44 = vld [vmem:[#allocation2 + $0x188] ss:$12 sps:$4 sm:$0xff]   ;;  %v1063_v45 = vld [vmem:[#allocation2 + $0x180] ss:$12 sps:$4 sm:$0xff]  }
  0x34   :  { %114 = vmatpush1.bf16.msra.mxu0 %v1015_v12  ;;  %v1060_v43 = vld [vmem:[#allocation2 + $0x184] ss:$12 sps:$4 sm:$0xff]   ;;  %v1064_v46 = vld [vmem:[#allocation2 + $0xc8] ss:$12 sps:$4 sm:$0xff]   ;;  %v1067_v48 = vld [vmem:[#allocation2 + $0x1a0] ss:$12 sps:$4 sm:$0xff]  }
  0x35   :  { %946 = vmatprep.subr.bf16.mxu0 %v1042_v20  ;;  %v1065_v47 = vld [vmem:[#allocation2 + $0x19c] ss:$12 sps:$4 sm:$0xff]   ;;  %v1068_v49 = vld [vmem:[#allocation2 + $0x198] ss:$12 sps:$4 sm:$0xff]   ;;  %v1069_v50 = vld [vmem:[#allocation2 + $0xe0] ss:$12 sps:$4 sm:$0xff]  }
  0x36   :  { %497 = vmatpush1.bf16.msra.mxu1 %v1027_v18  ;;  %v1070_v51 = vld [vmem:[#allocation2 + $0x1b4] ss:$12 sps:$4 sm:$0xff]   ;;  %v1072_v52 = vld [vmem:[#allocation2 + $0x1b8] ss:$12 sps:$4 sm:$0xff]   ;;  %v1073_v53 = vld [vmem:[#allocation2 + $0x1b0] ss:$12 sps:$4 sm:$0xff]  }
  0x37   :  { %878 = vmatmul.mubr.msk.bf16.vlgmr.msra.gmra.mrb[0].mxu0 %vm103_vm0, %v42_v16  ;;  %498 = vmatprep.subr.bf16.mxu1 %v1028_v19  ;;  %v1074_v54 = vld [vmem:[#allocation2 + $0xf8] ss:$12 sps:$4 sm:$0xff]   ;;  %v1077_v56 = vld [vmem:[#allocation2 + $0x1d0] ss:$12 sps:$4 sm:$0xff]   ;;  %v1078_v57 = vld [vmem:[#allocation2 + $0x1c8] ss:$12 sps:$4 sm:$0xff]  }
  0x38   :  { %947 = vmatpush3.bf16.msra.mxu0 %v1044_v21  ;;  %v1075_v55 = vld [vmem:[#allocation2 + $0x1cc] ss:$12 sps:$4 sm:$0xff]   ;;  %v1079_v58 = vld [vmem:[#allocation2 + $0x110] ss:$12 sps:$4 sm:$0xff]   ;;  %v55_v61 = vsub.s32 0, %v1216_v60  ;;  %v59_v63 = vsub.s32 1, %v1216_v60 }
  0x39   :  { %948 = vmatprep.subr.bf16.mxu0 %v1047_v24  ;;  %v51_v62 = vld [vmem:[#allocation4] ss:$8 sm:$0x3]  ;;  %v1081_v14 = vld [vmem:[#allocation2 + $0x1f8] ss:$12 sps:$4 sm:$0xff]   ;;  %v229_v21 = vsub.s32 2, %v1216_v60 }
  0x3a   :  { %499 = vmatpush1.bf16.msra.mxu1 %v1030_v22  ;;  %v56_v1 = vrot.slane %v51_v62, %v55_v61  ;;  %v60_v2 = vrot.slane %v51_v62, %v59_v63  ;;  %v1080_v13 = vld [vmem:[#allocation2 + $0x1e0] ss:$12 sps:$4 sm:$0xff]   ;;  %v1082_v15 = vld [vmem:[#allocation2 + $0x210] ss:$12 sps:$4 sm:$0xff]   ;;  %v1083_v16 = vld [vmem:[#allocation2 + $0x228] ss:$12 sps:$4 sm:$0xff]  }
  0x3b   :  { %500 = vmatprep.subr.bf16.mxu1 %v1031_v23  ;;  %v1084_v17 = vld [vmem:[#allocation2 + $0x240] ss:$12 sps:$4 sm:$0xff]   ;;  %v1085_v18 = vld [vmem:[#allocation2 + $0x258] ss:$12 sps:$4 sm:$0xff]   ;;  %v1086_v19 = vld [vmem:[#allocation2 + $0x270] ss:$12 sps:$4 sm:$0xff]  }
  0x3c   :  { %949 = vmatpush3.bf16.msra.mxu0 %v1049_v25  ;;  %v1087_v20 = vld [vmem:[#allocation2 + $0x288] ss:$12 sps:$4 sm:$0xff]   ;;  %v1088_v23 = vld [vmem:[#allocation2 + $0x2a0] ss:$12 sps:$4 sm:$0xff]   ;;  %s1161_s0 = smov 64   ;;  %vm1163_vm1 = vmmov 0  }
  0x3d   :  { %950 = vmatprep.subr.bf16.mxu0 %v1052_v27  ;;  %v217_v22 = vld [vmem:[#allocation4 + $0x1] ss:$8 sm:$0x7]  ;;  %vm745_vm2 = vcmask 261120   ;;  %vm862_vm3 = vcmask 57344  }
  0x3e   :  { %501 = vmatpush1.bf16.msra.mxu1 %v1033_v26  ;;  %v226_v26 = vrot.slane %v217_v22, %v59_v63  ;;  %v230_v27 = vrot.slane %v217_v22, %v229_v21 }
  0x3f   :  { %502 = vmatprep.subr.bf16.mxu1 %v1034_v28 }
  0x40   :  { %951 = vmatpush3.bf16.msra.mxu0 %v1054_v29 }
  0x41   :  { %952 = vmatprep.subr.bf16.mxu0 %v1057_v32 }
  0x42   :  { %503 = vmatpush1.bf16.msra.mxu1 %v1036_v30  ;;  %v1089_v30 = vld [vmem:[#allocation2 + $0x2b8] ss:$12 sps:$4 sm:$0xff]  }
  0x43   :  { %504 = vmatprep.subr.bf16.mxu1 %v1037_v31 }
  0x44   :  { %953 = vmatpush3.bf16.msra.mxu0 %v1059_v42 }
  0x45   :  { %954 = vmatprep.subr.bf16.mxu0 %v1062_v44 }
  0x46   :  { %505 = vmatpush1.bf16.msra.mxu1 %v1039_v33 }
  0x47   :  { %506 = vmatprep.subr.bf16.mxu1 %v1040_v34 }
  0x48   :  { %955 = vmatpush3.bf16.msra.mxu0 %v1064_v46 }
  0x49   :  { %956 = vmatprep.subr.bf16.mxu0 %v1067_v48 }
  0x4a   :  { %507 = vmatpush1.bf16.msra.mxu1 %v1043_v35 }
  0x4b   :  { %508 = vmatprep.subr.bf16.mxu1 %v1045_v36  ;;  %v1090_v36 = vld [vmem:[#allocation2 + $0x2d0] ss:$12 sps:$4 sm:$0xff]  }
  0x4c   :  { %957 = vmatpush3.bf16.msra.mxu0 %v1069_v50 }
  0x4d   :  { %958 = vmatprep.subr.bf16.mxu0 %v1072_v52 }
  0x4e   :  { %509 = vmatpush1.bf16.msra.mxu1 %v1048_v37 }
  0x4f   :  { %510 = vmatprep.subr.bf16.mxu1 %v1050_v38 }
  0x50   :  { %959 = vmatpush3.bf16.msra.mxu0 %v1074_v54  ;;  %v1093_v54 = vld [vmem:[#allocation2 + $0x318] ss:$12 sps:$4 sm:$0xff]  }
  0x51   :  { %960 = vmatprep.subr.bf16.mxu0 %v1077_v56 }
  0x52   :  { %511 = vmatpush1.bf16.msra.mxu1 %v1053_v39 }
  0x53   :  { %512 = vmatprep.subr.bf16.mxu1 %v1055_v40  ;;  %v1091_v40 = vld [vmem:[#allocation2 + $0x2e8] ss:$12 sps:$4 sm:$0xff]  }
  0x54   :  { %961 = vmatpush3.bf16.msra.mxu0 %v1079_v58 }
  0x55   :  { %686 = vmatprep.subr.bf16.mxu0 %v1160_v0 }
  0x56   :  { %513 = vmatpush1.bf16.msra.mxu1 %v1058_v41  ;;  %v222_v41 = vrot.slane %v217_v22, %v55_v61 }
  0x57   :  { %514 = vmatprep.subr.bf16.mxu1 %v1060_v43 }
  0x5a   :  { %515 = vmatpush1.bf16.msra.mxu1 %v1063_v45 }
  0x5b   :  { %516 = vmatprep.subr.bf16.mxu1 %v1065_v47 }
  0x5e   :  { %517 = vmatpush1.bf16.msra.mxu1 %v1068_v49 }
  0x5f   :  { %518 = vmatprep.subr.bf16.mxu1 %v1070_v51 }
  0x62   :  { %519 = vmatpush1.bf16.msra.mxu1 %v1073_v53  ;;  %v1162_v53 = vmov 0.0  }
  0x63   :  { %520 = vmatprep.subr.bf16.mxu1 %v1075_v55  ;;  %v610_v55 = vld [vmem:[#allocation4 + $0x2] ss:$0 sm:$0xff] }
  0x66   :  { %521 = vmatpush1.bf16.msra.mxu1 %v1078_v57 }
  0x67   :  { %974 = vmatprep.subr.bf16.mxu1 %v1162_v53 }
 0x10a   :  { %v141_v3 = vpop.f32.mrb[0].mxu0 }
 0x10b   :  { %v142_v4 = vadd.f32 %v141_v3, %v56_v1  ;;  %v143_v5 = vpop.f32.mrb[1].mxu0  ;;  %v1095_v3 = vld [vmem:[#allocation2 + $0x348] ss:$12 sps:$4 sm:$0xff]  }
 0x10c   :  { %v144_v6 = vadd.f32 %v143_v5, %v60_v2  ;;  %v145_v7 = vpop.f32.mrb[2].mxu0  ;;  %v1094_v2 = vld [vmem:[#allocation2 + $0x330] ss:$12 sps:$4 sm:$0xff]  }
 0x10d   :  { %v148_v8 = vpack.c.bf16 %v142_v4, %v142_v4  ;;  %v146_v9 = vpop.f32.mrb[3].mxu0  ;;  %v732_v4 = vld [vmem:[#allocation4 + $0x3] ss:$0 sm:$0xff] }
 0x10e   :  { %v149_v10 = vpack.c.bf16 %v144_v6, %v144_v6 }
 0x110   :  { %1096 = vtanh.bf16 %v149_v10 }
 0x111   :  { %1098 = vtanh.bf16 %v148_v8 }
 0x11b   :  { %v1097_v11 = vpop.eup %1096 }
 0x11c   :  { %v1099_v12 = vpop.eup %1098  ;;  %522 = vmatprep.mubr.bf16.mxu1 %v1097_v11  ;;  %563 = vmatprep.mubr.bf16.mxu0 %v1097_v11 }
 0x11d   :  { %523 = vmatmul.mubr.bf16.vlgmr.msra.gmra.mrb[0].mxu1 %v1099_v12  ;;  %564 = vmatmul.mubr.bf16.vlgmr.msra.gmra.mrb[4].mxu0 %v1099_v12  ;;  %v795_v12 = vld [vmem:[#allocation4 + $0x4] ss:$0 sm:$0xff] }
 0x11e   :  { %687 = vmatpush1.bf16.msra.mxu0 %v1080_v13  ;;  %978 = vmatprep.mubr.msk.bf16.mxu1 %vm1163_vm1, %v1162_v53 }
 0x11f   :  { %688 = vmatprep.subr.bf16.mxu0 %v1160_v0 }
 0x122   :  { %689 = vmatpush1.bf16.msra.mxu0 %v1081_v14 }
 0x123   :  { %690 = vmatprep.subr.bf16.mxu0 %v1160_v0 }
 0x126   :  { %691 = vmatpush1.bf16.msra.mxu0 %v1082_v15 }
 0x127   :  { %692 = vmatprep.subr.bf16.mxu0 %v1160_v0 }
 0x12a   :  { %693 = vmatpush1.bf16.msra.mxu0 %v1083_v16 }
 0x12b   :  { %694 = vmatprep.subr.bf16.mxu0 %v1160_v0 }
 0x12e   :  { %695 = vmatpush1.bf16.msra.mxu0 %v1084_v17 }
 0x12f   :  { %696 = vmatprep.subr.bf16.mxu0 %v1160_v0 }
 0x132   :  { %697 = vmatpush1.bf16.msra.mxu0 %v1085_v18  ;;  %v856_v18 = vand.u32 127, %v53_v59 }
 0x133   :  { %698 = vmatprep.subr.bf16.mxu0 %v1160_v0 }
 0x136   :  { %699 = vmatpush1.bf16.msra.mxu0 %v1086_v19  ;;  %v859_v19 = vsub.s32 %v856_v18, %v1216_v60 }
 0x137   :  { %700 = vmatprep.subr.bf16.mxu0 %v1160_v0 }
 0x13a   :  { %701 = vmatpush1.bf16.msra.mxu0 %v1087_v20 }
 0x13b   :  { %702 = vmatprep.subr.bf16.mxu0 %v1160_v0 }
 0x13e   :  { %703 = vmatpush1.bf16.msra.mxu0 %v1088_v23 }
 0x13f   :  { %704 = vmatprep.subr.bf16.mxu0 %v1160_v0 }
 0x142   :  { %705 = vmatpush1.bf16.msra.mxu0 %v1089_v30 }
 0x143   :  { %706 = vmatprep.subr.bf16.mxu0 %v1160_v0 }
 0x146   :  { %707 = vmatpush1.bf16.msra.mxu0 %v1090_v36 }
 0x147   :  { %708 = vmatprep.subr.bf16.mxu0 %v1160_v0  ;;  %v1092_v0 = vld [vmem:[#allocation2 + $0x300] ss:$12 sps:$4 sm:$0xff]  }
 0x148   :  { %975 = vmatpush3.bf16.msra.mxu1 %v1092_v0 }
 0x149   :  { %976 = vmatprep.subr.bf16.mxu1 %v1162_v53 }
 0x14a   :  { %709 = vmatpush1.bf16.msra.mxu0 %v1091_v40 }
 0x14c   :  { %977 = vmatpush3.bf16.msra.mxu1 %v1093_v54 }
 0x14d   :  { %982 = vmatprep.subr.bf16.mxu1 %v1162_v53 }
 0x1f0   :  { %v524_v24 = vpop.f32.mrb[0].mxu1  ;;  %v962_v25 = vpop.f32.mrb[4].mxu0 }
 0x1f1   :  { %v526_v28 = vpop.f32.mrb[1].mxu1  ;;  %v963_v29 = vpop.f32.mrb[5].mxu0  ;;  %v525_v45 = vadd.f32 %v524_v24, %v222_v41 }
 0x1f2   :  { %v964_v31 = vadd.f32 %v963_v29, %v962_v25  ;;  %v528_v32 = vpop.f32.mrb[2].mxu1  ;;  %v965_v33 = vpop.f32.mrb[6].mxu0  ;;  %v527_v37 = vadd.f32 %v526_v28, %v226_v26 }
 0x1f3   :  { %v529_v34 = vpop.f32.mrb[3].mxu1  ;;  %v966_v35 = vpop.f32.mrb[7].mxu0 }
 0x1f4   :  { %v566_v38 = vadd.f32 %v964_v31, %v230_v27 }
 0x1f6   :  { %v998_v39 = vpack.i.bf16 %v566_v38, %v527_v37 }
 0x1f8   :  { %999 = vrot.lane.b32.xlu0 %v998_v39, %s1161_s0 }
 0x26a   :  { %v1000_v42 = vpop.permute.xlu0 %999 }
 0x26b   :  { %v1002_v43 = vunpack.i.h.bf16 %v1000_v42  ;;  %v1001_v44 = vunpack.i.l.bf16 %v1000_v42 }
 0x26d   :  { %v581_v46 = vmax.f32 %v527_v37, %v1002_v43  ;;  %v577_v47 = vsel %vm103_vm0, %v1001_v44, %v1002_v43 }
 0x26e   :  { %v580_v48 = vmax.f32 %v525_v45, %v577_v47 }
 0x26f   :  { %v583_v49 = vpack.c.bf16 %v581_v46, %v581_v46 }
 0x270   :  { %v582_v50 = vpack.c.bf16 %v580_v48, %v580_v48 }
 0x271   :  { %1100 = vtanh.bf16 %v583_v49 }
 0x272   :  { %1102 = vtanh.bf16 %v582_v50 }
 0x27c   :  { %v1101_v51 = vpop.eup %1100 }
 0x27d   :  { %v1103_v52 = vpop.eup %1102  ;;  %939 = vmatprep.mubr.msk.bf16.mxu0 %vm103_vm0, %v1101_v51 }
 0x27e   :  { %719 = vmatmul.mubr.bf16.vlgmr.msra.gmra.mrb[8].mxu0 %v1103_v52 }
 0x351   :  { %v720_v56 = vpop.f32.mrb[8].mxu0 }
 0x352   :  { %v721_v57 = vadd.f32 %v720_v56, %v610_v55  ;;  %v722_v58 = vpop.f32.mrb[9].mxu0 }
 0x353   :  { %v723_v61 = vpop.f32.mrb[10].mxu0 }
 0x354   :  { %1104 = vtanh.f32 %v721_v57  ;;  %v724_v62 = vpop.f32.mrb[11].mxu0 }
 0x35e   :  { %v1105_v63 = vpop.eup %1104 }
 0x35f   :  { %v727_v1 = vpack.c.bf16 %v1105_v63, %v1105_v63 }
 0x361   :  { %979 = vmatmul.mubr.msk.bf16.vlgmr.msra.gmra.mrb[4].mxu1 %vm745_vm2, %v727_v1 }
 0x362   :  { %986 = vmatprep.mubr.msk.bf16.mxu1 %vm1163_vm1, %v1162_v53  ;;  %983 = vmatpush3.bf16.msra.mxu1 %v1094_v2 }
 0x363   :  { %984 = vmatprep.subr.bf16.mxu1 %v1162_v53 }
 0x366   :  { %985 = vmatpush3.bf16.msra.mxu1 %v1095_v3 }
 0x434   :  { %v783_v5 = vpop.f32.mrb[4].mxu1 }
 0x435   :  { %v784_v6 = vadd.f32 %v783_v5, %v732_v4  ;;  %v980_v7 = vpop.f32.mrb[5].mxu1 }
 0x436   :  { %v786_v8 = vpop.f32.mrb[6].mxu1 }
 0x437   :  { %1106 = vtanh.f32 %v784_v6  ;;  %v981_v9 = vpop.f32.mrb[7].mxu1 }
 0x441   :  { %v1107_v10 = vpop.eup %1106 }
 0x442   :  { %v790_v11 = vpack.c.bf16 %v1107_v10, %v1107_v10 }
 0x444   :  { %987 = vmatmul.mubr.msk.bf16.vlgmr.msra.gmra.mrb[8].mxu1 %vm745_vm2, %v790_v11 }
 0x517   :  { %v845_v13 = vpop.f32.mrb[8].mxu1 }
 0x518   :  { %v846_v14 = vadd.f32 %v845_v13, %v795_v12  ;;  %v988_v15 = vpop.f32.mrb[9].mxu1 }
 0x519   :  { %v848_v16 = vpop.f32.mrb[10].mxu1 }
 0x51a   :  { %853 = vperm.xlu0 %1003, %v846_v14   ;;  %v989_v17 = vpop.f32.mrb[11].mxu1 }
 0x599   :  { %v854_v20 = vpop.permute.xlu0 %853 }
 0x59a   :  { %v860_v21 = vrot.slane %v854_v20, %v859_v19 }
 0x59c   :  { %863 = vst.msk [vmem:[%s1248_s3] sm:$0x1] %vm862_vm3, %v860_v21 }
 0x59d   :  { %868 = vsyncpa [#allocation3], 1 }
 0x59e   :  { %869 = vsyncpa [#allocation5], 1 }

</bundles_post_ra>
